<compile_context>
chip_gen: v7x
topology: tpu7x:2x2x1
jax: 0.10.0
libtpu: 0.0.40
codegen_flags: <defaults>
</compile_context>

<pallas_src>
import functools

import jax
import jax.numpy as jnp
from jax.experimental import pallas as pl
from jax.experimental.pallas import tpu as pltpu


# ----------------------------------------------------------------------------
# helpers
# ----------------------------------------------------------------------------
def _layernorm(x, g, b, eps=1e-5):
    mu = jnp.mean(x, axis=-1, keepdims=True)
    var = jnp.mean((x - mu) ** 2, axis=-1, keepdims=True)
    return (x - mu) * jax.lax.rsqrt(var + eps) * g + b


# ----------------------------------------------------------------------------
# kernel: one (B_blk, S_pad, D) block per grid step, everything in VMEM
# ----------------------------------------------------------------------------
def _attention_block_kernel(
    x_ref, kb_ref, hm_ref,
    lng_ref, lnb_ref,
    wqkv_ref, bqkv_ref,
    wo_ref, bo_ref,
    o_ref,
    ctx_scr,
    *, num_heads, batch_block, seq_pad,
):
    D = x_ref.shape[-1]
    S = seq_pad
    H = num_heads
    mm = wqkv_ref.dtype                      # bf16 when weights pre-cast, else f32

    # ---- flatten (B_blk, S, D) -> (B_blk*S, D): batch folded into matmul M ----
    x = x_ref[...].reshape(batch_block * S, D)

    # ---- LayerNorm (f32, eps=1e-5) ----
    xn = _layernorm(x, lng_ref[...], lnb_ref[...])

    # ---- fused QKV projection: one (B_blk*S, D) @ (D, 3D) MXU op.
    #      1/sqrt(dh) already folded into the Q slice of wqkv/bqkv. ----
    qkv = jnp.dot(xn.astype(mm), wqkv_ref[...],
                  preferred_element_type=jnp.float32) + bqkv_ref[...]
    q = qkv[:, :D]
    k = qkv[:, D:2 * D]
    v = qkv[:, 2 * D:]

    kb = kb_ref[...]                         # (1, S)   additive key-pad bias
    hm = hm_ref[...]                         # (H*S, D) head mask: row h*S+s -> head-h lanes

    # ---- attention with heads packed along sublanes (row h*S+s = head h,
    #      query s): two MXU ops per batch element instead of 2*H tiny ones,
    #      lane-dense (S, D) context written into a VMEM scratch slice. ----
    for b in range(batch_block):             # small, unrolled at trace time
        rb, re = b * S, (b + 1) * S
        q_b, k_b, v_b = q[rb:re, :], k[rb:re, :], v[rb:re, :]

        # block-diagonal Q: off-head lanes zeroed so the full-D contraction
        # reduces to the per-head dh contraction.
        q_blk = (jnp.concatenate([q_b] * H, axis=0) * hm).astype(mm)   # (H*S, D)
        s_all = jax.lax.dot_general(                                   # (H*S, S)
            q_blk, k_b.astype(mm), (((1,), (1,)), ((), ())),
            preferred_element_type=jnp.float32)
        s_all = s_all + kb                                             # mask padded keys
        s_all = s_all - jnp.max(s_all, axis=-1, keepdims=True)
        p = jnp.exp(s_all)
        # softmax denominator on the EUP (frees the VPU divide)
        p = p * pl.reciprocal(jnp.sum(p, axis=-1, keepdims=True), approx=True)

        ctx_big = jnp.dot(p.astype(mm), v_b.astype(mm),
                          preferred_element_type=jnp.float32)          # (H*S, D)
        ctx_big = ctx_big * hm                   # keep only each head's lane slice
        ctx_b = ctx_big[0:S, :]
        for h in range(1, H):                    # H aligned sublane-slice adds
            ctx_b = ctx_b + ctx_big[h * S:(h + 1) * S, :]
        ctx_scr[rb:re, :] = ctx_b                # scratch-slice write (no concat)

    # ---- single batched output projection ----
    out = jnp.dot(ctx_scr[...].astype(mm), wo_ref[...],
                  preferred_element_type=jnp.float32) + bo_ref[...]
    o_ref[...] = out.reshape(batch_block, S, D)


# ----------------------------------------------------------------------------
# wrapper
# ----------------------------------------------------------------------------
def fuse_attention_params(params, num_heads, *, use_bf16_matmul=True):
    """Concatenate Q/K/V into one (D, 3D) weight / (1, 3D) bias, fold the
    1/sqrt(head_dim) attention scale into the Q slice, and (by default)
    pre-cast the matmul weights to bf16 once."""
    D = params["wq"].shape[0]
    scale = 1.0 / ((D // num_heads) ** 0.5)
    wqkv = jnp.concatenate(
        [params["wq"] * scale, params["wk"], params["wv"]], axis=1)
    bqkv = jnp.concatenate(
        [params["bq"] * scale, params["bk"], params["bv"]], axis=1)
    wo = params["wo"]
    if use_bf16_matmul:
        wqkv = wqkv.astype(jnp.bfloat16)
        wo = wo.astype(jnp.bfloat16)
    return {
        "ln_g": params["ln_g"].astype(jnp.float32),
        "ln_b": params["ln_b"].astype(jnp.float32),
        "wqkv": wqkv, "bqkv": bqkv.astype(jnp.float32),
        "wo": wo, "bo": params["bo"].astype(jnp.float32),
    }


def attention_block(x, fused, *, num_heads, batch_block=None):
    B, S, D = x.shape
    assert D % num_heads == 0
    if batch_block is None:
        batch_block = B                      # whole batch folded into one grid step
    assert B % batch_block == 0

    bf16_mm = fused["wqkv"].dtype == jnp.bfloat16
    align = 16 if bf16_mm else 8             # bf16 packs 2 rows per sublane
    S_pad = ((S + align - 1) // align) * align
    if S_pad != S:
        x = jnp.pad(x, ((0, 0), (0, S_pad - S), (0, 0)))

    # additive key-pad bias (safe: scores stay f32, row-max subtracted pre-exp)
    key_bias = jnp.where(jnp.arange(S_pad) < S, 0.0, -1e30)
    key_bias = key_bias.astype(jnp.float32).reshape(1, S_pad)

    # head mask: row h*S_pad+s has ones on head h's lane slice
    dh = D // num_heads
    head_mask = (jnp.repeat(jnp.arange(num_heads), S_pad)[:, None]
                 == (jnp.arange(D) // dh)[None, :]).astype(jnp.float32)

    kernel = functools.partial(
        _attention_block_kernel,
        num_heads=num_heads, batch_block=batch_block, seq_pad=S_pad)

    def const(shape):
        return pl.BlockSpec(shape, lambda b: (0,) * len(shape))

    out = pl.pallas_call(
        kernel,
        out_shape=jax.ShapeDtypeStruct((B, S_pad, D), jnp.float32),
        grid=(B // batch_block,),
        in_specs=[
            pl.BlockSpec((batch_block, S_pad, D), lambda b: (b, 0, 0)),  # x
            const((1, S_pad)),                                           # key-pad bias
            const((num_heads * S_pad, D)),                               # head mask
            const((1, D)), const((1, D)),                                # layernorm
            const((D, 3 * D)), const((1, 3 * D)),                        # fused qkv
            const((D, D)), const((1, D)),                                # out proj
        ],
        out_specs=pl.BlockSpec((batch_block, S_pad, D), lambda b: (b, 0, 0)),
        scratch_shapes=[pltpu.VMEM((batch_block * S_pad, D), jnp.float32)],
        # On v7x, pass batch_block=B//2 and switch to pltpu.CORE_PARALLEL here
        # to split grid steps across both TensorCores.
        compiler_params=pltpu.CompilerParams(
            dimension_semantics=("parallel",)),
    )(x, key_bias, head_mask, fused["ln_g"], fused["ln_b"],
      fused["wqkv"], fused["bqkv"], fused["wo"], fused["bo"])

    return out[:, :S, :]


# ----------------------------------------------------------------------------
# pure-JAX reference (mirrors nn.LayerNorm + nn.MultiheadAttention forward)
# ----------------------------------------------------------------------------
def attention_block_ref(x, params, num_heads):
    B, S, D = x.shape
    dh = D // num_heads
    mu = jnp.mean(x, axis=-1, keepdims=True)
    var = jnp.mean((x - mu) ** 2, axis=-1, keepdims=True)
    xn = (x - mu) / jnp.sqrt(var + 1e-5) * params["ln_g"] + params["ln_b"]
    q = xn @ params["wq"] + params["bq"]
    k = xn @ params["wk"] + params["bk"]
    v = xn @ params["wv"] + params["bv"]
    q = q.reshape(B, S, num_heads, dh).transpose(0, 2, 1, 3)
    k = k.reshape(B, S, num_heads, dh).transpose(0, 2, 1, 3)
    v = v.reshape(B, S, num_heads, dh).transpose(0, 2, 1, 3)
    s = jnp.einsum("bhqd,bhkd->bhqk", q, k) / jnp.sqrt(dh)
    p = jax.nn.softmax(s, axis=-1)
    ctx = jnp.einsum("bhqk,bhkd->bhqd", p, v)
    ctx = ctx.transpose(0, 2, 1, 3).reshape(B, S, D)
    return ctx @ params["wo"] + params["bo"]


# ----------------------------------------------------------------------------
# deterministic parameter init (weights stored as (in, out), i.e. x @ w)
# ----------------------------------------------------------------------------
def init_params(key, D):
    ks = jax.random.split(key, 8)
    s = 0.05
    return {
        "ln_g": jnp.ones((1, D), jnp.float32),
        "ln_b": jnp.zeros((1, D), jnp.float32),
        "wq": jax.random.normal(ks[0], (D, D), jnp.float32) * s,
        "bq": jax.random.normal(ks[1], (1, D), jnp.float32) * s,
        "wk": jax.random.normal(ks[2], (D, D), jnp.float32) * s,
        "bk": jax.random.normal(ks[3], (1, D), jnp.float32) * s,
        "wv": jax.random.normal(ks[4], (D, D), jnp.float32) * s,
        "bv": jax.random.normal(ks[5], (1, D), jnp.float32) * s,
        "wo": jax.random.normal(ks[6], (D, D), jnp.float32) * s,
        "bo": jax.random.normal(ks[7], (1, D), jnp.float32) * s,
    }


if __name__ == "__main__":
    # small config consistent with the module (embed dim divisible by heads)
    B, S, D, HEADS = 2, 16, 128, 4

    key = jax.random.PRNGKey(0)
    kx, kp = jax.random.split(key)
    x = jax.random.normal(kx, (B, S, D), jnp.float32)
    params = init_params(kp, D)
    ref = attention_block_ref(x, params, HEADS)

    fwd = jax.jit(functools.partial(attention_block, num_heads=HEADS))

    # default fast path: bf16 MXU operands, f32 accumulation
    fused_bf16 = fuse_attention_params(params, HEADS, use_bf16_matmul=True)
    out = fwd(x, fused_bf16)
    jax.block_until_ready(out)
    assert out.shape == (B, S, D)
    assert bool(jnp.all(jnp.isfinite(out)))
    assert bool(jnp.allclose(out, ref, atol=5e-2, rtol=5e-2)), float(
        jnp.max(jnp.abs(out - ref)))

    # exact-semantics path: f32 operands (same kernel, f32 weights)
    fused_f32 = fuse_attention_params(params, HEADS, use_bf16_matmul=False)
    out32 = fwd(x, fused_f32)
    jax.block_until_ready(out32)
    assert bool(jnp.allclose(out32, ref, atol=5e-3, rtol=5e-3)), float(
        jnp.max(jnp.abs(out32 - ref)))

    # TODO(synk): attn_dropout is identity at p=0 / eval; no kernel emitted for it.
    print("KERNEL_OK")
</pallas_src>

<mosaic_0001>
module attributes {stable_mosaic.version = 11 : i64} {
  func.func @_attention_block_kernel(%arg0: i32, %arg1: memref<2x16x128xf32, #tpu.memory_space<vmem>>, %arg2: memref<1x16xf32, #tpu.memory_space<vmem>>, %arg3: memref<64x128xf32, #tpu.memory_space<vmem>>, %arg4: memref<1x128xf32, #tpu.memory_space<vmem>>, %arg5: memref<1x128xf32, #tpu.memory_space<vmem>>, %arg6: memref<128x384xbf16, #tpu.memory_space<vmem>>, %arg7: memref<1x384xf32, #tpu.memory_space<vmem>>, %arg8: memref<128x128xbf16, #tpu.memory_space<vmem>>, %arg9: memref<1x128xf32, #tpu.memory_space<vmem>>, %arg10: memref<2x16x128xf32, #tpu.memory_space<vmem>>, %arg11: memref<32x128xf32, #tpu.memory_space<vmem>>) attributes {dimension_semantics = [#tpu.dimension_semantics<parallel>], iteration_bounds = array<i64: 1>, scalar_prefetch = 0 : i64, scratch_operands = 1 : i64, tpu.core_type = #tpu.core_type<tc>, window_params = [{transform_indices = @transform_0, window_bounds = array<i64: 2, 16, 128>}, {pipeline_mode = #tpu.pipeline_mode<synchronous>, transform_indices = @transform_1, window_bounds = array<i64: 1, 16>}, {pipeline_mode = #tpu.pipeline_mode<synchronous>, transform_indices = @transform_2, window_bounds = array<i64: 64, 128>}, {pipeline_mode = #tpu.pipeline_mode<synchronous>, transform_indices = @transform_3, window_bounds = array<i64: 1, 128>}, {pipeline_mode = #tpu.pipeline_mode<synchronous>, transform_indices = @transform_4, window_bounds = array<i64: 1, 128>}, {pipeline_mode = #tpu.pipeline_mode<synchronous>, transform_indices = @transform_5, window_bounds = array<i64: 128, 384>}, {pipeline_mode = #tpu.pipeline_mode<synchronous>, transform_indices = @transform_6, window_bounds = array<i64: 1, 384>}, {pipeline_mode = #tpu.pipeline_mode<synchronous>, transform_indices = @transform_7, window_bounds = array<i64: 128, 128>}, {pipeline_mode = #tpu.pipeline_mode<synchronous>, transform_indices = @transform_8, window_bounds = array<i64: 1, 128>}, {transform_indices = @transform_9, window_bounds = array<i64: 2, 16, 128>}]} {
    %c0 = arith.constant 0 : index
    %c0_0 = arith.constant 0 : index
    %c0_1 = arith.constant 0 : index
    %0 = vector.load %arg1[%c0, %c0_0, %c0_1] : memref<2x16x128xf32, #tpu.memory_space<vmem>>, vector<2x16x128xf32>
    %1 = vector.shape_cast %0 : vector<2x16x128xf32> to vector<32x128xf32>
    %c0_2 = arith.constant 0 : index
    %c0_3 = arith.constant 0 : index
    %2 = vector.load %arg4[%c0_2, %c0_3] : memref<1x128xf32, #tpu.memory_space<vmem>>, vector<1x128xf32>
    %c0_4 = arith.constant 0 : index
    %c0_5 = arith.constant 0 : index
    %3 = vector.load %arg5[%c0_4, %c0_5] : memref<1x128xf32, #tpu.memory_space<vmem>>, vector<1x128xf32>
    %cst = arith.constant dense<0.000000e+00> : vector<32xf32>
    %4 = vector.multi_reduction <add>, %1, %cst [1] : vector<32x128xf32> to vector<32xf32>
    %5 = vector.shape_cast %4 : vector<32xf32> to vector<32x1xf32>
    %cst_6 = arith.constant 1.280000e+02 : f32
    %6 = vector.broadcast %cst_6 : f32 to vector<32x1xf32>
    %7 = arith.divf %5, %6 : vector<32x1xf32>
    %8 = vector.broadcast %7 : vector<32x1xf32> to vector<32x128xf32>
    %9 = arith.subf %1, %8 : vector<32x128xf32>
    %10 = arith.mulf %9, %9 : vector<32x128xf32>
    %cst_7 = arith.constant dense<0.000000e+00> : vector<32xf32>
    %11 = vector.multi_reduction <add>, %10, %cst_7 [1] : vector<32x128xf32> to vector<32xf32>
    %12 = vector.shape_cast %11 : vector<32xf32> to vector<32x1xf32>
    %cst_8 = arith.constant 1.280000e+02 : f32
    %13 = vector.broadcast %cst_8 : f32 to vector<32x1xf32>
    %14 = arith.divf %12, %13 : vector<32x1xf32>
    %15 = vector.broadcast %7 : vector<32x1xf32> to vector<32x128xf32>
    %16 = arith.subf %1, %15 : vector<32x128xf32>
    %cst_9 = arith.constant 9.99999974E-6 : f32
    %17 = vector.broadcast %cst_9 : f32 to vector<32x1xf32>
    %18 = arith.addf %14, %17 : vector<32x1xf32>
    %19 = math.rsqrt %18 : vector<32x1xf32>
    %20 = vector.broadcast %19 : vector<32x1xf32> to vector<32x128xf32>
    %21 = arith.mulf %16, %20 : vector<32x128xf32>
    %22 = vector.broadcast %2 : vector<1x128xf32> to vector<32x128xf32>
    %23 = arith.mulf %21, %22 : vector<32x128xf32>
    %24 = vector.broadcast %3 : vector<1x128xf32> to vector<32x128xf32>
    %25 = arith.addf %23, %24 : vector<32x128xf32>
    %26 = arith.truncf %25 : vector<32x128xf32> to vector<32x128xbf16>
    %c0_10 = arith.constant 0 : index
    %c0_11 = arith.constant 0 : index
    %27 = vector.load %arg6[%c0_10, %c0_11] : memref<128x384xbf16, #tpu.memory_space<vmem>>, vector<128x384xbf16>
    %cst_12 = arith.constant dense<0.000000e+00> : vector<32x384xf32>
    %28 = tpu.matmul %26, %27, %cst_12 {dimension_numbers = #tpu.dot_dimension_numbers<[1], [0], [0], [1], [0, 0, 1, 1], [], []>} : vector<32x128xbf16>, vector<128x384xbf16>, vector<32x384xf32> -> vector<32x384xf32>
    %c0_13 = arith.constant 0 : index
    %c0_14 = arith.constant 0 : index
    %29 = vector.load %arg7[%c0_13, %c0_14] : memref<1x384xf32, #tpu.memory_space<vmem>>, vector<1x384xf32>
    %30 = vector.broadcast %29 : vector<1x384xf32> to vector<32x384xf32>
    %31 = arith.addf %28, %30 : vector<32x384xf32>
    %32 = vector.extract_strided_slice %31 {offsets = [0, 0], sizes = [32, 128], strides = [1, 1]} : vector<32x384xf32> to vector<32x128xf32>
    %33 = vector.extract_strided_slice %31 {offsets = [0, 128], sizes = [32, 128], strides = [1, 1]} : vector<32x384xf32> to vector<32x128xf32>
    %34 = vector.extract_strided_slice %31 {offsets = [0, 256], sizes = [32, 128], strides = [1, 1]} : vector<32x384xf32> to vector<32x128xf32>
    %c0_15 = arith.constant 0 : index
    %c0_16 = arith.constant 0 : index
    %35 = vector.load %arg2[%c0_15, %c0_16] : memref<1x16xf32, #tpu.memory_space<vmem>>, vector<1x16xf32>
    %c0_17 = arith.constant 0 : index
    %c0_18 = arith.constant 0 : index
    %36 = vector.load %arg3[%c0_17, %c0_18] : memref<64x128xf32, #tpu.memory_space<vmem>>, vector<64x128xf32>
    %37 = vector.extract_strided_slice %32 {offsets = [0, 0], sizes = [16, 128], strides = [1, 1]} : vector<32x128xf32> to vector<16x128xf32>
    %38 = vector.extract_strided_slice %33 {offsets = [0, 0], sizes = [16, 128], strides = [1, 1]} : vector<32x128xf32> to vector<16x128xf32>
    %39 = vector.extract_strided_slice %34 {offsets = [0, 0], sizes = [16, 128], strides = [1, 1]} : vector<32x128xf32> to vector<16x128xf32>
    %40 = tpu.concatenate %37, %37, %37, %37 in 0 : vector<16x128xf32>, vector<16x128xf32>, vector<16x128xf32>, vector<16x128xf32> -> vector<64x128xf32>
    %41 = arith.mulf %40, %36 : vector<64x128xf32>
    %42 = arith.truncf %41 : vector<64x128xf32> to vector<64x128xbf16>
    %43 = arith.truncf %38 : vector<16x128xf32> to vector<16x128xbf16>
    %cst_19 = arith.constant dense<0.000000e+00> : vector<64x16xf32>
    %44 = tpu.matmul %42, %43, %cst_19 {dimension_numbers = #tpu.dot_dimension_numbers<[1], [1], [0], [0], [0, 0, 1, 0], [], []>} : vector<64x128xbf16>, vector<16x128xbf16>, vector<64x16xf32> -> vector<64x16xf32>
    %45 = vector.broadcast %35 : vector<1x16xf32> to vector<64x16xf32>
    %46 = arith.addf %44, %45 : vector<64x16xf32>
    %cst_20 = arith.constant dense<0xFF800000> : vector<64xf32>
    %47 = vector.multi_reduction <maximumf>, %46, %cst_20 [1] : vector<64x16xf32> to vector<64xf32>
    %48 = vector.shape_cast %47 : vector<64xf32> to vector<64x1xf32>
    %49 = vector.broadcast %48 : vector<64x1xf32> to vector<64x16xf32>
    %50 = arith.subf %46, %49 : vector<64x16xf32>
    %51 = math.exp %50 : vector<64x16xf32>
    %cst_21 = arith.constant dense<0.000000e+00> : vector<64xf32>
    %52 = vector.multi_reduction <add>, %51, %cst_21 [1] : vector<64x16xf32> to vector<64xf32>
    %53 = vector.shape_cast %52 : vector<64xf32> to vector<64x1xf32>
    %54 = tpu.reciprocal %53 {approx = true} : vector<64x1xf32> -> vector<64x1xf32>
    %55 = vector.broadcast %54 : vector<64x1xf32> to vector<64x16xf32>
    %56 = arith.mulf %51, %55 : vector<64x16xf32>
    %57 = arith.truncf %56 : vector<64x16xf32> to vector<64x16xbf16>
    %58 = arith.truncf %39 : vector<16x128xf32> to vector<16x128xbf16>
    %cst_22 = arith.constant dense<0.000000e+00> : vector<64x128xf32>
    %59 = tpu.matmul %57, %58, %cst_22 {dimension_numbers = #tpu.dot_dimension_numbers<[1], [0], [0], [1], [0, 0, 1, 1], [], []>} : vector<64x16xbf16>, vector<16x128xbf16>, vector<64x128xf32> -> vector<64x128xf32>
    %60 = arith.mulf %59, %36 : vector<64x128xf32>
    %61 = vector.extract_strided_slice %60 {offsets = [0, 0], sizes = [16, 128], strides = [1, 1]} : vector<64x128xf32> to vector<16x128xf32>
    %62 = vector.extract_strided_slice %60 {offsets = [16, 0], sizes = [16, 128], strides = [1, 1]} : vector<64x128xf32> to vector<16x128xf32>
    %63 = arith.addf %61, %62 : vector<16x128xf32>
    %64 = vector.extract_strided_slice %60 {offsets = [32, 0], sizes = [16, 128], strides = [1, 1]} : vector<64x128xf32> to vector<16x128xf32>
    %65 = arith.addf %63, %64 : vector<16x128xf32>
    %66 = vector.extract_strided_slice %60 {offsets = [48, 0], sizes = [16, 128], strides = [1, 1]} : vector<64x128xf32> to vector<16x128xf32>
    %67 = arith.addf %65, %66 : vector<16x128xf32>
    %c0_23 = arith.constant 0 : index
    %c0_24 = arith.constant 0 : index
    %68 = vector.load %arg11[%c0_23, %c0_24] : memref<32x128xf32, #tpu.memory_space<vmem>>, vector<16x128xf32>
    tpu.vector_store %arg11[%c0_23, %c0_24], %67 {strides = array<i32>} : memref<32x128xf32, #tpu.memory_space<vmem>>, vector<16x128xf32>,
    %69 = vector.extract_strided_slice %32 {offsets = [16, 0], sizes = [16, 128], strides = [1, 1]} : vector<32x128xf32> to vector<16x128xf32>
    %70 = vector.extract_strided_slice %33 {offsets = [16, 0], sizes = [16, 128], strides = [1, 1]} : vector<32x128xf32> to vector<16x128xf32>
    %71 = vector.extract_strided_slice %34 {offsets = [16, 0], sizes = [16, 128], strides = [1, 1]} : vector<32x128xf32> to vector<16x128xf32>
    %72 = tpu.concatenate %69, %69, %69, %69 in 0 : vector<16x128xf32>, vector<16x128xf32>, vector<16x128xf32>, vector<16x128xf32> -> vector<64x128xf32>
    %73 = arith.mulf %72, %36 : vector<64x128xf32>
    %74 = arith.truncf %73 : vector<64x128xf32> to vector<64x128xbf16>
    %75 = arith.truncf %70 : vector<16x128xf32> to vector<16x128xbf16>
    %cst_25 = arith.constant dense<0.000000e+00> : vector<64x16xf32>
    %76 = tpu.matmul %74, %75, %cst_25 {dimension_numbers = #tpu.dot_dimension_numbers<[1], [1], [0], [0], [0, 0, 1, 0], [], []>} : vector<64x128xbf16>, vector<16x128xbf16>, vector<64x16xf32> -> vector<64x16xf32>
    %77 = vector.broadcast %35 : vector<1x16xf32> to vector<64x16xf32>
    %78 = arith.addf %76, %77 : vector<64x16xf32>
    %cst_26 = arith.constant dense<0xFF800000> : vector<64xf32>
    %79 = vector.multi_reduction <maximumf>, %78, %cst_26 [1] : vector<64x16xf32> to vector<64xf32>
    %80 = vector.shape_cast %79 : vector<64xf32> to vector<64x1xf32>
    %81 = vector.broadcast %80 : vector<64x1xf32> to vector<64x16xf32>
    %82 = arith.subf %78, %81 : vector<64x16xf32>
    %83 = math.exp %82 : vector<64x16xf32>
    %cst_27 = arith.constant dense<0.000000e+00> : vector<64xf32>
    %84 = vector.multi_reduction <add>, %83, %cst_27 [1] : vector<64x16xf32> to vector<64xf32>
    %85 = vector.shape_cast %84 : vector<64xf32> to vector<64x1xf32>
    %86 = tpu.reciprocal %85 {approx = true} : vector<64x1xf32> -> vector<64x1xf32>
    %87 = vector.broadcast %86 : vector<64x1xf32> to vector<64x16xf32>
    %88 = arith.mulf %83, %87 : vector<64x16xf32>
    %89 = arith.truncf %88 : vector<64x16xf32> to vector<64x16xbf16>
    %90 = arith.truncf %71 : vector<16x128xf32> to vector<16x128xbf16>
    %cst_28 = arith.constant dense<0.000000e+00> : vector<64x128xf32>
    %91 = tpu.matmul %89, %90, %cst_28 {dimension_numbers = #tpu.dot_dimension_numbers<[1], [0], [0], [1], [0, 0, 1, 1], [], []>} : vector<64x16xbf16>, vector<16x128xbf16>, vector<64x128xf32> -> vector<64x128xf32>
    %92 = arith.mulf %91, %36 : vector<64x128xf32>
    %93 = vector.extract_strided_slice %92 {offsets = [0, 0], sizes = [16, 128], strides = [1, 1]} : vector<64x128xf32> to vector<16x128xf32>
    %94 = vector.extract_strided_slice %92 {offsets = [16, 0], sizes = [16, 128], strides = [1, 1]} : vector<64x128xf32> to vector<16x128xf32>
    %95 = arith.addf %93, %94 : vector<16x128xf32>
    %96 = vector.extract_strided_slice %92 {offsets = [32, 0], sizes = [16, 128], strides = [1, 1]} : vector<64x128xf32> to vector<16x128xf32>
    %97 = arith.addf %95, %96 : vector<16x128xf32>
    %98 = vector.extract_strided_slice %92 {offsets = [48, 0], sizes = [16, 128], strides = [1, 1]} : vector<64x128xf32> to vector<16x128xf32>
    %99 = arith.addf %97, %98 : vector<16x128xf32>
    %c16 = arith.constant 16 : index
    %c0_29 = arith.constant 0 : index
    %100 = vector.load %arg11[%c16, %c0_29] : memref<32x128xf32, #tpu.memory_space<vmem>>, vector<16x128xf32>
    tpu.vector_store %arg11[%c16, %c0_29], %99 {strides = array<i32>} : memref<32x128xf32, #tpu.memory_space<vmem>>, vector<16x128xf32>,
    %c0_30 = arith.constant 0 : index
    %c0_31 = arith.constant 0 : index
    %101 = vector.load %arg11[%c0_30, %c0_31] : memref<32x128xf32, #tpu.memory_space<vmem>>, vector<32x128xf32>
    %102 = arith.truncf %101 : vector<32x128xf32> to vector<32x128xbf16>
    %c0_32 = arith.constant 0 : index
    %c0_33 = arith.constant 0 : index
    %103 = vector.load %arg8[%c0_32, %c0_33] : memref<128x128xbf16, #tpu.memory_space<vmem>>, vector<128x128xbf16>
    %cst_34 = arith.constant dense<0.000000e+00> : vector<32x128xf32>
    %104 = tpu.matmul %102, %103, %cst_34 {dimension_numbers = #tpu.dot_dimension_numbers<[1], [0], [0], [1], [0, 0, 1, 1], [], []>} : vector<32x128xbf16>, vector<128x128xbf16>, vector<32x128xf32> -> vector<32x128xf32>
    %c0_35 = arith.constant 0 : index
    %c0_36 = arith.constant 0 : index
    %105 = vector.load %arg9[%c0_35, %c0_36] : memref<1x128xf32, #tpu.memory_space<vmem>>, vector<1x128xf32>
    %106 = vector.broadcast %105 : vector<1x128xf32> to vector<32x128xf32>
    %107 = arith.addf %104, %106 : vector<32x128xf32>
    %108 = vector.shape_cast %107 : vector<32x128xf32> to vector<2x16x128xf32>
    %c0_37 = arith.constant 0 : index
    %c0_38 = arith.constant 0 : index
    %c0_39 = arith.constant 0 : index
    %109 = vector.load %arg10[%c0_37, %c0_38, %c0_39] : memref<2x16x128xf32, #tpu.memory_space<vmem>>, vector<2x16x128xf32>
    tpu.vector_store %arg10[%c0_37, %c0_38, %c0_39], %108 {strides = array<i32>} : memref<2x16x128xf32, #tpu.memory_space<vmem>>, vector<2x16x128xf32>,
    return
  }
  func.func @transform_0(%arg0: i32) -> (i32, i32, i32) {
    %c0_i32 = arith.constant 0 : i32
    %c0_i32_0 = arith.constant 0 : i32
    %c0_i32_1 = arith.constant 0 : i32
    return %arg0, %c0_i32, %c0_i32_0 : i32, i32, i32
  }
  func.func @transform_1(%arg0: i32) -> (i32, i32) {
    %c0_i32 = arith.constant 0 : i32
    %c0_i32_0 = arith.constant 0 : i32
    %c0_i32_1 = arith.constant 0 : i32
    return %c0_i32, %c0_i32_0 : i32, i32
  }
  func.func @transform_2(%arg0: i32) -> (i32, i32) {
    %c0_i32 = arith.constant 0 : i32
    %c0_i32_0 = arith.constant 0 : i32
    %c0_i32_1 = arith.constant 0 : i32
    return %c0_i32, %c0_i32_0 : i32, i32
  }
  func.func @transform_3(%arg0: i32) -> (i32, i32) {
    %c0_i32 = arith.constant 0 : i32
    %c0_i32_0 = arith.constant 0 : i32
    %c0_i32_1 = arith.constant 0 : i32
    return %c0_i32, %c0_i32_0 : i32, i32
  }
  func.func @transform_4(%arg0: i32) -> (i32, i32) {
    %c0_i32 = arith.constant 0 : i32
    %c0_i32_0 = arith.constant 0 : i32
    %c0_i32_1 = arith.constant 0 : i32
    return %c0_i32, %c0_i32_0 : i32, i32
  }
  func.func @transform_5(%arg0: i32) -> (i32, i32) {
    %c0_i32 = arith.constant 0 : i32
    %c0_i32_0 = arith.constant 0 : i32
    %c0_i32_1 = arith.constant 0 : i32
    return %c0_i32, %c0_i32_0 : i32, i32
  }
  func.func @transform_6(%arg0: i32) -> (i32, i32) {
    %c0_i32 = arith.constant 0 : i32
    %c0_i32_0 = arith.constant 0 : i32
    %c0_i32_1 = arith.constant 0 : i32
    return %c0_i32, %c0_i32_0 : i32, i32
  }
  func.func @transform_7(%arg0: i32) -> (i32, i32) {
    %c0_i32 = arith.constant 0 : i32
    %c0_i32_0 = arith.constant 0 : i32
    %c0_i32_1 = arith.constant 0 : i32
    return %c0_i32, %c0_i32_0 : i32, i32
  }
  func.func @transform_8(%arg0: i32) -> (i32, i32) {
    %c0_i32 = arith.constant 0 : i32
    %c0_i32_0 = arith.constant 0 : i32
    %c0_i32_1 = arith.constant 0 : i32
    return %c0_i32, %c0_i32_0 : i32, i32
  }
  func.func @transform_9(%arg0: i32) -> (i32, i32, i32) {
    %c0_i32 = arith.constant 0 : i32
    %c0_i32_0 = arith.constant 0 : i32
    %c0_i32_1 = arith.constant 0 : i32
    return %arg0, %c0_i32, %c0_i32_0 : i32, i32, i32
  }
}

</mosaic_0001>

<bundles_post_ra>
// kernel: eq.8
= control target key start
LH: loop header
LB: loop body
LE: loop exit
PB: predicated region body
PF: predicated region fallthrough
CT: control target
= control target key end

     0   :  { %vm7_vm0 = vcmask 130048   ;;  %s37_s8 = smov 16   ;;  %s38_s9 = smov 32   ;;  %vm13_vm1 = vcmask 523648   ;;  %vm19_vm2 = vcmask 392448   ;;  %vm25_vm3 = vcmask 261248   ;;  %s55_s0 = inlined_call_operand.vmem [shape: s32[4,16], index: 0, kind: input, shape index: {}]   ;;  %s56_s1 = inlined_call_operand.vmem [shape: s32[64], index: 1, kind: output, shape index: {}]  }
   0x1   :  { %v4_v0 = vld [vmem:[%s55_s0] sm:$0xf]  ;;  %s36_s0 = smov 48  }
   0x2   :  { %5 = vst [vmem:[#allocation1] sm:$0xf] %v4_v0 }
   0x9   :  { %v10_v1 = vld [vmem:[#allocation1 + $0x3] sm:$0x1]   ;;  %v22_v2 = vld [vmem:[#allocation1 + $0x1] sm:$0x1]   ;;  %v6_v3 = vld [vmem:[#allocation1] sm:$0x1]  }
   0xa   :  { %11 = vrot.lane.b32.xlu0 %v10_v1, %s36_s0  ;;  %23 = vrot.lane.b32.xlu1 %v22_v2, %s37_s8  ;;  %v16_v4 = vld [vmem:[#allocation1 + $0x2] sm:$0x1]   ;;  %8 = vst.msk [vmem:[#allocation0] sm:$0x1] %vm7_vm0, %v6_v3  }
   0xe   :  { %17 = vrot.lane.b32.xlu0 %v16_v4, %s38_s9 }
  0x7c   :  { %v12_v5 = vpop.permute.xlu0 %11   ;;  %v24_v6 = vpop.permute.xlu1 %23  }
  0x7d   :  { %14 = vst.msk [vmem:[#allocation0] sm:$0x1] %vm13_vm1, %v12_v5  }
  0x80   :  { %v18_v7 = vpop.permute.xlu0 %17  }
  0x81   :  { %20 = vst.msk [vmem:[#allocation0] sm:$0x1] %vm19_vm2, %v18_v7  }
  0x82   :  { %26 = vst.msk [vmem:[#allocation0] sm:$0x1] %vm25_vm3, %v24_v6  }
  0x89   :  { %v30_v8 = vld [vmem:[#allocation0] sm:$0x1] }
  0x8a   :  { %32 = vst [vmem:[%s56_s1] sm:$0x1] %v30_v8 }

// kernel: attention_block.1
= control target key start
LH: loop header
LB: loop body
LE: loop exit
PB: predicated region body
PF: predicated region fallthrough
CT: control target
= control target key end

     0   :  { %14 = vsyncpa [#allocation4], 0  ;;  %s1864_s0 = inlined_call_operand.vmem [shape: f32[2,16,128], index: 0, kind: input, shape index: {}]   ;;  %s1865_s1 = inlined_call_operand.vmem [shape: f32[1,16], index: 1, kind: input, shape index: {}]   ;;  %s1866_s2 = inlined_call_operand.vmem [shape: f32[64,128], index: 2, kind: input, shape index: {}]   ;;  %s1867_s3 = inlined_call_operand.vmem [shape: f32[1,128], index: 3, kind: input, shape index: {}]   ;;  %s1868_s4 = inlined_call_operand.vmem [shape: f32[1,128], index: 4, kind: input, shape index: {}]   ;;  %s1869_s5 = inlined_call_operand.hbm [shape: bf16[128,384], index: 5, kind: input, shape index: {}]   ;;  %s1870_s6 = inlined_call_operand.vmem [shape: f32[1,384], index: 6, kind: input, shape index: {}]   ;;  %s1871_s7 = inlined_call_operand.vmem [shape: bf16[128,128], index: 7, kind: input, shape index: {}]   ;;  %s1872_s8 = inlined_call_operand.hbm [shape: f32[1,128], index: 8, kind: input, shape index: {}]   ;;  %s1873_s9 = inlined_call_operand.hbm [shape: f32[2,16,128], index: 9, kind: output, shape index: {}]  }
   0x1   :  { %15 = vsyncpa [#allocation7], 0 }
   0x2   :  { %16 = vsyncpa [#allocation5], 0  ;;  %s1462_s30 = smov [#allocation3]   ;;  %s1390_s13 = scalar_lea.hbm %s1869_s5, 3072 }
   0x3   :  { %s32_s10 = sshll.u32 %s1462_s30, 4  ;;  %p1391_p0 = scmp.ne.s32.totalorder %s1869_s5, %s1390_s13  ;;  %s33_s10 = int_to_ptr.vmem [resolvable:$true] %s32_s10 }
   0x4   :  { %p1394_p1 = scmp.lt.u32.totalorder %s1390_s13, %s1869_s5 }
   0x6   :  { %p1396_p2 = pnand %p1394_p1, %p1391_p0 }
   0x8   :  { %1399 = shalt.err (!%p1396_p2)
}
   0x9   :  { %s1400_s18 = scalar_lea.vmem %s33_s10, 3072  ;;  %p1405_p4 = scmp.lt.s32.totalorder %s33_s10, %s33_s10 }
   0xa   :  { %p1401_p3 = scmp.ne.s32.totalorder %s33_s10, %s1400_s18  ;;  %p1406_p5 = scmp.lt.s32.totalorder %s1400_s18, %s1400_s18 }
   0xc   :  { %p1407_p6 = por %p1406_p5, %p1405_p4 }
   0xe   :  { %p1408_p7 = pnand %p1407_p6, %p1401_p3 }
  0x10   :  { %1411 = shalt.err (!%p1408_p7)
}
  0x11   :  { %s1463_s19 = smov 192   ;;  %s1464_s20 = smov 12  }
  0x12   :  { %38 = dma.hbm_to_vmem [thread:$0]  %s1869_s5, 3072, %s33_s10, [#allocation4], %s1463_s19, %s1463_s19, %s1464_s20  }
  0x13   :  { %s1465_s23 = smov [#allocation6]   ;;  %s1412_s27 = scalar_lea.hbm %s1872_s8, 16 }
  0x14   :  { %s49_s24 = sshll.u32 %s1465_s23, 4  ;;  %p1413_p8 = scmp.ne.s32.totalorder %s1872_s8, %s1412_s27  ;;  %s50_s24 = int_to_ptr.vmem [resolvable:$true] %s49_s24 }
  0x15   :  { %p1416_p9 = scmp.lt.u32.totalorder %s1412_s27, %s1872_s8 }
  0x17   :  { %p1418_p10 = pnand %p1416_p9, %p1413_p8 }
  0x19   :  { %1421 = shalt.err (!%p1418_p10)
}
  0x1a   :  { %s1422_s12 = scalar_lea.vmem %s50_s24, 16  ;;  %s1426_s5 = scalar_lea.vmem %s50_s24, 32 }
  0x1b   :  { %p1423_p11 = scmp.ne.s32.totalorder %s50_s24, %s1422_s12  ;;  %p1427_p12 = scmp.lt.s32.totalorder %s50_s24, %s50_s24 }
  0x1c   :  { %p1428_p13 = scmp.lt.s32.totalorder %s1426_s5, %s1422_s12 }
  0x1e   :  { %p1429_p0 = por %p1428_p13, %p1427_p12 }
  0x20   :  { %p1430_p1 = pnand %p1429_p0, %p1423_p11 }
  0x22   :  { %1433 = shalt.err (!%p1430_p1)
}
  0x23   :  { %52 = dma.hbm_to_vmem [thread:$0]  %s1872_s8, 16, %s50_s24, [#allocation7]  }
  0x24   :  { %1456 = dma.done.wait [#allocation4], 3072  }
  0x25   :  { %1457 = vsyncadd [#allocation4], 4294964224 }
  0x26   :  { %1458 = dma.done.wait [#allocation7], 16  }
  0x27   :  { %1459 = vsyncadd [#allocation7], 4294967280  ;;  %v60_v0 = vld [vmem:[%s1864_s0] sm:$0xff]  ;;  %v62_v1 = vld [vmem:[%s1864_s0 + $0x10] sm:$0xff]  ;;  %v1466_v39 = vmov 0   ;;  %vm505_vm0 = vcmask 130048  }
  0x28   :  { %v61_v2 = vld [vmem:[%s1864_s0 + $0x8] sm:$0xff]  ;;  %66 = vadd.xlane.f32.xlu0 %v60_v0  ;;  %70 = vadd.xlane.f32.xlu1 %v62_v1  ;;  %v63_v3 = vld [vmem:[%s1864_s0 + $0x18] sm:$0xff]  ;;  %v1278_v4 = vld [vmem:[#allocation3 + $0x4] ss:$12 sps:$4 sm:$0xff]  }
  0x29   :  { %v1280_v5 = vld [vmem:[#allocation3] ss:$12 sps:$4 sm:$0xff]   ;;  %v1281_v6 = vld [vmem:[#allocation3 + $0x1c] ss:$12 sps:$4 sm:$0xff]   ;;  %310 = vmatprep.subr.bf16.mxu0 %v1278_v4  ;;  %v1284_v24 = vld [vmem:[#allocation3 + $0x18] ss:$12 sps:$4 sm:$0xff]   ;;  %342 = vmatprep.mubr.bf16.mxu0 %v1466_v39 }
  0x2a   :  { %v1283_v7 = vld [vmem:[#allocation3 + $0x8] ss:$12 sps:$4 sm:$0xff]   ;;  %311 = vmatpush1.bf16.msra.mxu0 %v1280_v5  ;;  %v1287_v26 = vld [vmem:[#allocation3 + $0x20] ss:$12 sps:$4 sm:$0xff]   ;;  %v1288_v27 = vld [vmem:[#allocation3 + $0x30] ss:$12 sps:$4 sm:$0xff]  }
  0x2b   :  { %1188 = vmatprep.subr.bf16.mxu1 %v1283_v7  ;;  %312 = vmatprep.subr.bf16.mxu0 %v1281_v6  ;;  %v1285_v25 = vld [vmem:[#allocation3 + $0x34] ss:$12 sps:$4 sm:$0xff]   ;;  %v1289_v28 = vld [vmem:[#allocation3 + $0x4c] ss:$12 sps:$4 sm:$0xff]   ;;  %v1293_v31 = vld [vmem:[#allocation3 + $0x64] ss:$12 sps:$4 sm:$0xff]  }
  0x2c   :  { %68 = vadd.xlane.f32.xlu0 %v61_v2  ;;  %72 = vadd.xlane.f32.xlu1 %v63_v3  ;;  %v1291_v29 = vld [vmem:[#allocation3 + $0x38] ss:$12 sps:$4 sm:$0xff]   ;;  %v1292_v30 = vld [vmem:[#allocation3 + $0x48] ss:$12 sps:$4 sm:$0xff]   ;;  %v1295_v32 = vld [vmem:[#allocation3 + $0x50] ss:$12 sps:$4 sm:$0xff]  }
  0x2d   :  { %1189 = vmatpush3.bf16.msra.mxu1 %v1283_v7  ;;  %v1296_v33 = vld [vmem:[#allocation3 + $0x60] ss:$12 sps:$4 sm:$0xff]   ;;  %v1297_v34 = vld [vmem:[#allocation3 + $0x7c] ss:$12 sps:$4 sm:$0xff]   ;;  %v1300_v36 = vld [vmem:[#allocation3 + $0x78] ss:$12 sps:$4 sm:$0xff]  }
  0x2e   :  { %313 = vmatpush1.bf16.msra.mxu0 %v1284_v24  ;;  %1190 = vmatprep.subr.bf16.mxu1 %v1287_v26  ;;  %v1299_v35 = vld [vmem:[#allocation3 + $0x68] ss:$12 sps:$4 sm:$0xff]   ;;  %v1303_v38 = vld [vmem:[#allocation3 + $0x80] ss:$12 sps:$4 sm:$0xff]   ;;  %v1304_v40 = vld [vmem:[#allocation3 + $0x90] ss:$12 sps:$4 sm:$0xff]  }
  0x2f   :  { %314 = vmatprep.subr.bf16.mxu0 %v1285_v25  ;;  %v1301_v37 = vld [vmem:[#allocation3 + $0x94] ss:$12 sps:$4 sm:$0xff]   ;;  %v1305_v41 = vld [vmem:[#allocation3 + $0xac] ss:$12 sps:$4 sm:$0xff]   ;;  %v1309_v44 = vld [vmem:[#allocation3 + $0xb0] ss:$12 sps:$4 sm:$0xff]  }
  0x30   :  { %v1307_v42 = vld [vmem:[#allocation3 + $0x98] ss:$12 sps:$4 sm:$0xff]   ;;  %v1308_v43 = vld [vmem:[#allocation3 + $0xa8] ss:$12 sps:$4 sm:$0xff]   ;;  %v1104_v59 = vld [vmem:[%s1867_s3] ss:$0 sm:$0xff] }
  0x31   :  { %1191 = vmatpush3.bf16.msra.mxu1 %v1287_v26  ;;  %v1593_v24 = vld [vmem:[%s1866_s2 + $0x30] sm:$0xff]  ;;  %v1598_v26 = vld [vmem:[%s1866_s2 + $0x18] sm:$0xff] }
  0x32   :  { %315 = vmatpush1.bf16.msra.mxu0 %v1288_v27  ;;  %1192 = vmatprep.subr.bf16.mxu1 %v1291_v29 }
  0x33   :  { %316 = vmatprep.subr.bf16.mxu0 %v1289_v28  ;;  %v1603_v28 = vld [vmem:[%s1866_s2 + $0x38] sm:$0xff] }
  0x35   :  { %1193 = vmatpush3.bf16.msra.mxu1 %v1291_v29 }
  0x36   :  { %317 = vmatpush1.bf16.msra.mxu0 %v1292_v30  ;;  %1194 = vmatprep.subr.bf16.mxu1 %v1295_v32  ;;  %v1608_v30 = vld [vmem:[%s1866_s2] sm:$0xff] }
  0x37   :  { %318 = vmatprep.subr.bf16.mxu0 %v1293_v31  ;;  %v1613_v31 = vld [vmem:[%s1866_s2 + $0x8] sm:$0xff] }
  0x39   :  { %1195 = vmatpush3.bf16.msra.mxu1 %v1295_v32 }
  0x3a   :  { %319 = vmatpush1.bf16.msra.mxu0 %v1296_v33  ;;  %1196 = vmatprep.subr.bf16.mxu1 %v1299_v35 }
  0x3b   :  { %320 = vmatprep.subr.bf16.mxu0 %v1297_v34  ;;  %v1618_v34 = vld [vmem:[%s1866_s2 + $0x20] sm:$0xff] }
  0x3d   :  { %1197 = vmatpush3.bf16.msra.mxu1 %v1299_v35  ;;  %v1623_v35 = vld [vmem:[%s1866_s2 + $0x28] sm:$0xff] }
  0x3e   :  { %321 = vmatpush1.bf16.msra.mxu0 %v1300_v36  ;;  %1198 = vmatprep.subr.bf16.mxu1 %v1303_v38 }
  0x3f   :  { %322 = vmatprep.subr.bf16.mxu0 %v1301_v37 }
  0x41   :  { %1199 = vmatpush3.bf16.msra.mxu1 %v1303_v38 }
  0x42   :  { %323 = vmatpush1.bf16.msra.mxu0 %v1304_v40  ;;  %1200 = vmatprep.subr.bf16.mxu1 %v1307_v42 }
  0x43   :  { %324 = vmatprep.subr.bf16.mxu0 %v1305_v41 }
  0x45   :  { %1201 = vmatpush3.bf16.msra.mxu1 %v1307_v42 }
  0x46   :  { %325 = vmatpush1.bf16.msra.mxu0 %v1308_v43  ;;  %1202 = vmatprep.subr.bf16.mxu1 %v1309_v44 }
  0x49   :  { %1203 = vmatpush3.bf16.msra.mxu1 %v1309_v44 }
  0xb5   :  { %v67_v8 = vpop.xlane.xlu0 %66  ;;  %v71_v9 = vpop.xlane.xlu1 %70 }
  0xb6   :  { %v75_v10 = vmul.f32 0.0078125, %v67_v8  ;;  %v77_v11 = vmul.f32 0.0078125, %v71_v9 }
  0xb8   :  { %v1556_v12 = vsub.f32 %v60_v0, %v75_v10  ;;  %v1558_v13 = vsub.f32 %v62_v1, %v77_v11  ;;  %v1105_v0 = vld [vmem:[%s1868_s4] ss:$0 sm:$0xff] }
  0xb9   :  { %v69_v14 = vpop.xlane.xlu0 %68  ;;  %v73_v15 = vpop.xlane.xlu1 %72 }
  0xba   :  { %v76_v16 = vmul.f32 0.0078125, %v69_v14  ;;  %v83_v17 = vmul.f32 %v1556_v12, %v1556_v12  ;;  %v78_v18 = vmul.f32 0.0078125, %v73_v15  ;;  %v85_v21 = vmul.f32 %v1558_v13, %v1558_v13 }
  0xbb   :  { %v167_v14 = vlaneseq }
  0xbc   :  { %v1562_v19 = vsub.f32 %v61_v2, %v76_v16  ;;  %87 = vadd.xlane.f32.xlu0 %v83_v17  ;;  %v1564_v20 = vsub.f32 %v63_v3, %v78_v18  ;;  %v165_v16 = vld [vmem:[%s1870_s6] sm:$0x7] }
  0xbd   :  { %v168_v15 = vshrl.u32 %v167_v14, 7 }
  0xbe   :  { %v84_v22 = vmul.f32 %v1562_v19, %v1562_v19  ;;  %v86_v23 = vmul.f32 %v1564_v20, %v1564_v20 }
  0xbf   :  { %v173_v17 = vsub.s32 1, %v168_v15 }
  0xc0   :  { %91 = vadd.xlane.f32.xlu0 %v85_v21  ;;  %89 = vadd.xlane.f32.xlu1 %v84_v22 }
  0xc1   :  { %v174_v21 = vrot.slane %v165_v16, %v173_v17 }
  0xc4   :  { %93 = vadd.xlane.f32.xlu1 %v86_v23  ;;  %v1588_v23 = vld [vmem:[%s1866_s2 + $0x10] sm:$0xff] }
 0x149   :  { %v88_v45 = vpop.xlane.xlu0 %87 }
 0x14a   :  { %v95_v46 = vmul.f32 0.0078125, %v88_v45 }
 0x14c   :  { %v99_v47 = vadd.f32 1e-05, %v95_v46 }
 0x14d   :  { %v90_v48 = vpop.xlane.xlu1 %89  ;;  %v92_v49 = vpop.xlane.xlu0 %91 }
 0x14e   :  { %1318 = vrsqrt.f32 %v99_v47  ;;  %v96_v50 = vmul.f32 0.0078125, %v90_v48  ;;  %v97_v51 = vmul.f32 0.0078125, %v92_v49 }
 0x150   :  { %v100_v52 = vadd.f32 1e-05, %v96_v50  ;;  %v101_v53 = vadd.f32 1e-05, %v97_v51 }
 0x151   :  { %v94_v54 = vpop.xlane.xlu1 %93 }
 0x152   :  { %1320 = vrsqrt.f32 %v100_v52  ;;  %v98_v55 = vmul.f32 0.0078125, %v94_v54 }
 0x153   :  { %1322 = vrsqrt.f32 %v101_v53 }
 0x154   :  { %v102_v56 = vadd.f32 1e-05, %v98_v55 }
 0x156   :  { %1324 = vrsqrt.f32 %v102_v56 }
 0x158   :  { %v1319_v57 = vpop.eup %1318 }
 0x159   :  { %v107_v58 = vmul.f32 %v1319_v57, %v1556_v12 }
 0x15b   :  { %v117_v63 = vmul.f32 %v1104_v59, %v107_v58 }
 0x15c   :  { %v1321_v60 = vpop.eup %1320 }
 0x15d   :  { %v1323_v61 = vpop.eup %1322  ;;  %v108_v62 = vmul.f32 %v1321_v60, %v1562_v19  ;;  %v127_v4 = vadd.f32 %v1105_v0, %v117_v63  ;;  %v177_v19 = vsub.s32 2, %v168_v15 }
 0x15e   :  { %v109_v1 = vmul.f32 %v1323_v61, %v1558_v13  ;;  %v169_v13 = vsub.s32 0, %v168_v15 }
 0x15f   :  { %v118_v2 = vmul.f32 %v1104_v59, %v108_v62  ;;  %v178_v29 = vrot.slane %v165_v16, %v177_v19 }
 0x160   :  { %v1325_v3 = vpop.eup %1324  ;;  %v119_v7 = vmul.f32 %v1104_v59, %v109_v1  ;;  %v170_v18 = vrot.slane %v165_v16, %v169_v13 }
 0x161   :  { %v128_v5 = vadd.f32 %v1105_v0, %v118_v2  ;;  %v110_v6 = vmul.f32 %v1325_v3, %v1564_v20 }
 0x162   :  { %v129_v10 = vadd.f32 %v1105_v0, %v119_v7 }
 0x163   :  { %v131_v8 = vpack.c.bf16 %v128_v5, %v127_v4  ;;  %v120_v9 = vmul.f32 %v1104_v59, %v110_v6 }
 0x165   :  { %343 = vmatmul.mubr.bf16.vlgmr.msra.gmra.mrb[0].mxu0 %v131_v8  ;;  %1204 = vmatprep.mubr.bf16.mxu1 %v131_v8  ;;  %v130_v11 = vadd.f32 %v1105_v0, %v120_v9 }
 0x166   :  { %352 = vmatprep.mubr.bf16.mxu0 %v1466_v39 }
 0x167   :  { %v132_v12 = vpack.c.bf16 %v130_v11, %v129_v10 }
 0x169   :  { %1205 = vmatmul.mubr.bf16.vlgmr.msra.gmra.mrb[0].mxu1 %v132_v12 }
 0x16d   :  { %353 = vmatmul.mubr.bf16.gmra.mrb[4].mxu0 %v132_v12 }
 0x238   :  { %v344_v20 = vpop.f32.mrb[0].mxu0 }
 0x239   :  { %v345_v22 = vadd.f32 %v344_v20, %v170_v18  ;;  %v346_v25 = vpop.f32.mrb[1].mxu0 }
 0x23a   :  { %v348_v27 = vpop.f32.mrb[2].mxu0  ;;  %v347_v38 = vadd.f32 %v346_v25, %v174_v21 }
 0x23b   :  { %v349_v32 = vadd.f32 %v348_v27, %v170_v18  ;;  %v350_v33 = vpop.f32.mrb[3].mxu0  ;;  %v423_v36 = vmul.f32 %v1588_v23, %v345_v22  ;;  %v427_v37 = vmul.f32 %v1593_v24, %v345_v22  ;;  %v421_v44 = vmul.f32 %v1608_v30, %v345_v22 }
 0x23c   :  { %v351_v39 = vadd.f32 %v350_v33, %v174_v21  ;;  %v1206_v40 = vpop.f32.mrb[0].mxu1  ;;  %v425_v49 = vmul.f32 %v1618_v34, %v345_v22 }
 0x23d   :  { %v424_v41 = vmul.f32 %v1598_v26, %v349_v32  ;;  %v428_v42 = vmul.f32 %v1603_v28, %v349_v32  ;;  %v397_v43 = vpop.f32.mrb[1].mxu1  ;;  %v422_v45 = vmul.f32 %v1613_v31, %v349_v32  ;;  %v406_v47 = vadd.f32 %v1206_v40, %v178_v29 }
 0x23e   :  { %v433_v46 = vpack.c.bf16 %v351_v39, %v347_v38  ;;  %v1207_v48 = vpop.f32.mrb[2].mxu1  ;;  %v426_v50 = vmul.f32 %v1623_v35, %v349_v32  ;;  %v398_v56 = vadd.f32 %v397_v43, %v178_v29 }
 0x23f   :  { %v430_v51 = vpack.c.bf16 %v424_v41, %v423_v36  ;;  %v409_v52 = vadd.f32 %v1207_v48, %v178_v29  ;;  %v400_v53 = vpop.f32.mrb[3].mxu1  ;;  %v429_v54 = vpack.c.bf16 %v422_v45, %v421_v44  ;;  %v432_v55 = vpack.c.bf16 %v428_v42, %v427_v37 }
 0x240   :  { %v401_v57 = vadd.f32 %v400_v53, %v178_v29  ;;  %v354_v58 = vpop.f32.mrb[4].mxu0  ;;  %1208 = vmatprep.subr.bf16.mxu0 %v433_v46  ;;  %1268 = vmatprep.subr.bf16.mxu1 %v433_v46  ;;  %v431_v59 = vpack.c.bf16 %v426_v50, %v425_v49 }
 0x241   :  { %v1633_v60 = vpack.c.bf16 %v409_v52, %v406_v47  ;;  %v355_v61 = vadd.f32 %v354_v58, %v170_v18  ;;  %v356_v62 = vpop.f32.mrb[5].mxu0  ;;  %1209 = vmatpush3.bf16.xpose.msra.mxu0 %v433_v46  ;;  %1269 = vmatpush3.bf16.xpose.msra.mxu1 %v433_v46 }
 0x242   :  { %v598_v63 = vpack.c.bf16 %v401_v57, %v398_v56  ;;  %1210 = vmatprep.mubr.bf16.mxu0 %v429_v54  ;;  %1214 = vmatprep.mubr.bf16.mxu1 %v431_v59  ;;  %v358_v0 = vpop.f32.mrb[6].mxu0  ;;  %v357_v2 = vadd.f32 %v356_v62, %v174_v21 }
 0x243   :  { %v694_v1 = vmul.f32 %v1588_v23, %v355_v61  ;;  %v359_v3 = vadd.f32 %v358_v0, %v170_v18  ;;  %v360_v4 = vpop.f32.mrb[7].mxu0  ;;  %v692_v6 = vmul.f32 %v1608_v30, %v355_v61  ;;  %v696_v7 = vmul.f32 %v1618_v34, %v355_v61  ;;  %v1130_v18 = vld [vmem:[%s1865_s1] ss:$0 sm:$0xff] }
 0x244   :  { %v361_v5 = vadd.f32 %v360_v4, %v174_v21  ;;  %1218 = vmatprep.subr.bf16.mxu0 %v598_v63  ;;  %v698_v8 = vmul.f32 %v1593_v24, %v355_v61 }
 0x245   :  { %v695_v9 = vmul.f32 %v1598_v26, %v359_v3  ;;  %v693_v10 = vmul.f32 %v1613_v31, %v359_v3  ;;  %v697_v11 = vmul.f32 %v1623_v35, %v359_v3  ;;  %v699_v12 = vmul.f32 %v1603_v28, %v359_v3 }
 0x246   :  { %v704_v14 = vpack.c.bf16 %v361_v5, %v357_v2 }
 0x247   :  { %v700_v15 = vpack.c.bf16 %v693_v10, %v692_v6  ;;  %v701_v13 = vpack.c.bf16 %v695_v9, %v694_v1  ;;  %v702_v16 = vpack.c.bf16 %v697_v11, %v696_v7  ;;  %v703_v17 = vpack.c.bf16 %v699_v12, %v698_v8 }
 0x248   :  { %1211 = vmatmul.mubr.bf16.vlgmr.msra.gmra.mrb[8].mxu0 %v430_v51  ;;  %1215 = vmatmul.mubr.bf16.vlgmr.msra.gmra.mrb[4].mxu1 %v432_v55 }
 0x249   :  { %1228 = vmatprep.subr.bf16.mxu1 %v704_v14  ;;  %1219 = vmatpush3.bf16.msra.mxu0 %v598_v63 }
 0x24a   :  { %1229 = vmatpush3.bf16.xpose.msra.mxu1 %v704_v14  ;;  %1230 = vmatprep.mubr.bf16.mxu1 %v700_v15 }
 0x24b   :  { %1238 = vmatprep.subr.bf16.mxu0 %v1633_v60 }
 0x251   :  { %1231 = vmatmul.mubr.bf16.vlgmr.msra.gmra.mrb[8].mxu1 %v701_v13 }
 0x252   :  { %1234 = vmatprep.mubr.bf16.mxu1 %v702_v16 }
 0x259   :  { %1235 = vmatmul.mubr.bf16.gmra.mrb[12].mxu1 %v703_v17 }
 0x31b   :  { %v1212_v19 = vpop.f32.mrb[8].mxu0  ;;  %v1216_v20 = vpop.f32.mrb[4].mxu1 }
 0x31c   :  { %v474_v21 = vpop.f32.mrb[9].mxu0  ;;  %v490_v22 = vpop.f32.mrb[5].mxu1  ;;  %v1649_v36 = vadd.f32 %v1212_v19, %v1130_v18  ;;  %v1664_v48 = vadd.f32 %v1216_v20, %v1130_v18 }
 0x31d   :  { %v1647_v25 = vadd.f32 %v1130_v18, %v474_v21  ;;  %v1213_v27 = vpop.f32.mrb[10].mxu0  ;;  %v1217_v29 = vpop.f32.mrb[6].mxu1  ;;  %v1656_v41 = vadd.f32 %v1130_v18, %v490_v22 }
 0x31e   :  { %v477_v32 = vpop.f32.mrb[11].mxu0  ;;  %v493_v33 = vpop.f32.mrb[7].mxu1  ;;  %v1653_v39 = vadd.f32 %v1213_v27, %v1130_v18  ;;  %v512_v42 = vsel %vm505_vm0, %v1649_v36, -inf  ;;  %v1668_v51 = vadd.f32 %v1217_v29, %v1130_v18  ;;  %v524_v54 = vsel %vm505_vm0, %v1664_v48, -inf }
 0x31f   :  { %v478_v37 = vadd.f32 %v1130_v18, %v477_v32  ;;  %v506_v38 = vsel %vm505_vm0, %v1647_v25, -inf  ;;  %v1660_v44 = vadd.f32 %v1130_v18, %v493_v33  ;;  %v518_v50 = vsel %vm505_vm0, %v1656_v41, -inf }
 0x320   :  { %507 = vmax.xlane.f32.xlu0 %v506_v38  ;;  %v515_v46 = vsel %vm505_vm0, %v1653_v39, -inf  ;;  %v527_v58 = vsel %vm505_vm0, %v1668_v51, -inf }
 0x321   :  { %v509_v40 = vsel %vm505_vm0, %v478_v37, -inf  ;;  %v521_v52 = vsel %vm505_vm0, %v1660_v44, -inf }
 0x322   :  { %510 = vmax.xlane.f32.xlu1 %v509_v40 }
 0x324   :  { %v1232_v43 = vpop.f32.mrb[8].mxu1  ;;  %513 = vmax.xlane.f32.xlu0 %v512_v42 }
 0x325   :  { %v739_v45 = vpop.f32.mrb[9].mxu1  ;;  %v1680_v61 = vadd.f32 %v1232_v43, %v1130_v18 }
 0x326   :  { %v1233_v47 = vpop.f32.mrb[10].mxu1  ;;  %516 = vmax.xlane.f32.xlu1 %v515_v46  ;;  %v1672_v53 = vadd.f32 %v1130_v18, %v739_v45 }
 0x327   :  { %v742_v49 = vpop.f32.mrb[11].mxu1  ;;  %v1684_v0 = vadd.f32 %v1233_v47, %v1130_v18  ;;  %v776_v3 = vsel %vm505_vm0, %v1680_v61, -inf }
 0x328   :  { %519 = vmax.xlane.f32.xlu0 %v518_v50  ;;  %v1676_v56 = vadd.f32 %v1130_v18, %v742_v49  ;;  %v770_v63 = vsel %vm505_vm0, %v1672_v53, -inf }
 0x329   :  { %v779_v5 = vsel %vm505_vm0, %v1684_v0, -inf }
 0x32a   :  { %522 = vmax.xlane.f32.xlu1 %v521_v52  ;;  %v773_v1 = vsel %vm505_vm0, %v1676_v56, -inf }
 0x32c   :  { %v1236_v55 = vpop.f32.mrb[12].mxu1  ;;  %525 = vmax.xlane.f32.xlu0 %v524_v54 }
 0x32d   :  { %v755_v57 = vpop.f32.mrb[13].mxu1  ;;  %v1696_v6 = vadd.f32 %v1236_v55, %v1130_v18 }
 0x32e   :  { %v1237_v59 = vpop.f32.mrb[14].mxu1  ;;  %528 = vmax.xlane.f32.xlu1 %v527_v58  ;;  %v1688_v2 = vadd.f32 %v1130_v18, %v755_v57 }
 0x32f   :  { %v758_v62 = vpop.f32.mrb[15].mxu1  ;;  %v1700_v8 = vadd.f32 %v1237_v59, %v1130_v18  ;;  %v788_v10 = vsel %vm505_vm0, %v1696_v6, -inf }
 0x330   :  { %771 = vmax.xlane.f32.xlu0 %v770_v63  ;;  %v1692_v4 = vadd.f32 %v1130_v18, %v758_v62  ;;  %v782_v7 = vsel %vm505_vm0, %v1688_v2, -inf }
 0x331   :  { %v791_v11 = vsel %vm505_vm0, %v1700_v8, -inf }
 0x332   :  { %774 = vmax.xlane.f32.xlu1 %v773_v1  ;;  %v785_v9 = vsel %vm505_vm0, %v1692_v4, -inf }
 0x334   :  { %777 = vmax.xlane.f32.xlu0 %v776_v3 }
 0x336   :  { %780 = vmax.xlane.f32.xlu1 %v779_v5 }
 0x338   :  { %783 = vmax.xlane.f32.xlu0 %v782_v7 }
 0x33a   :  { %786 = vmax.xlane.f32.xlu1 %v785_v9 }
 0x33c   :  { %789 = vmax.xlane.f32.xlu0 %v788_v10 }
 0x33e   :  { %792 = vmax.xlane.f32.xlu1 %v791_v11 }
 0x3ad   :  { %v508_v12 = vpop.xlane.xlu0 %507 }
 0x3ae   :  { %v530_v14 = vsub.f32 %v1647_v25, %v508_v12 }
 0x3af   :  { %v511_v15 = vpop.xlane.xlu1 %510 }
 0x3b0   :  { %v538_v13 = vmul.f32 1.442695, %v530_v14  ;;  %v531_v16 = vsub.f32 %v478_v37, %v511_v15 }
 0x3b1   :  { %v514_v17 = vpop.xlane.xlu0 %513 }
 0x3b2   :  { %1326 = vpow2.f32 %v538_v13  ;;  %v540_v18 = vmul.f32 1.442695, %v531_v16  ;;  %v532_v19 = vsub.f32 %v1649_v36, %v514_v17 }
 0x3b3   :  { %v517_v20 = vpop.xlane.xlu1 %516 }
 0x3b4   :  { %1328 = vpow2.f32 %v540_v18  ;;  %v542_v21 = vmul.f32 1.442695, %v532_v19  ;;  %v533_v22 = vsub.f32 %v1653_v39, %v517_v20 }
 0x3b5   :  { %v520_v27 = vpop.xlane.xlu0 %519 }
 0x3b6   :  { %1330 = vpow2.f32 %v542_v21  ;;  %v544_v29 = vmul.f32 1.442695, %v533_v22  ;;  %v534_v32 = vsub.f32 %v1656_v41, %v520_v27 }
 0x3b7   :  { %v523_v33 = vpop.xlane.xlu1 %522 }
 0x3b8   :  { %1332 = vpow2.f32 %v544_v29  ;;  %v546_v25 = vmul.f32 1.442695, %v534_v32  ;;  %v535_v37 = vsub.f32 %v1660_v44, %v523_v33 }
 0x3b9   :  { %v526_v38 = vpop.xlane.xlu0 %525 }
 0x3ba   :  { %1334 = vpow2.f32 %v546_v25  ;;  %v548_v40 = vmul.f32 1.442695, %v535_v37  ;;  %v536_v36 = vsub.f32 %v1664_v48, %v526_v38 }
 0x3bb   :  { %v529_v42 = vpop.xlane.xlu1 %528 }
 0x3bc   :  { %v1714_v43 = vpop.eup %1326  ;;  %1336 = vpow2.f32 %v548_v40  ;;  %v550_v39 = vmul.f32 1.442695, %v536_v36  ;;  %v537_v45 = vsub.f32 %v1668_v51, %v529_v42 }
 0x3bd   :  { %v772_v46 = vpop.xlane.xlu0 %771  ;;  %v554_v41 = vsel %vm505_vm0, %v1714_v43, 0.0 }
 0x3be   :  { %v1719_v47 = vpop.eup %1328  ;;  %1338 = vpow2.f32 %v550_v39  ;;  %v552_v44 = vmul.f32 1.442695, %v537_v45  ;;  %v794_v49 = vsub.f32 %v1672_v53, %v772_v46  ;;  %555 = vadd.xlane.f32.xlu0 %v554_v41 }
 0x3bf   :  { %v775_v50 = vpop.xlane.xlu1 %774  ;;  %v557_v48 = vsel %vm505_vm0, %v1719_v47, 0.0 }
 0x3c0   :  { %v1724_v52 = vpop.eup %1330  ;;  %1340 = vpow2.f32 %v552_v44  ;;  %v802_v54 = vmul.f32 1.442695, %v794_v49  ;;  %v795_v51 = vsub.f32 %v1676_v56, %v775_v50  ;;  %558 = vadd.xlane.f32.xlu1 %v557_v48 }
 0x3c1   :  { %v778_v55 = vpop.xlane.xlu0 %777  ;;  %v560_v57 = vsel %vm505_vm0, %v1724_v52, 0.0 }
 0x3c2   :  { %v1729_v58 = vpop.eup %1332  ;;  %1342 = vpow2.f32 %v802_v54  ;;  %v804_v53 = vmul.f32 1.442695, %v795_v51  ;;  %v796_v59 = vsub.f32 %v1680_v61, %v778_v55  ;;  %561 = vadd.xlane.f32.xlu0 %v560_v57 }
 0x3c3   :  { %v781_v62 = vpop.xlane.xlu1 %780  ;;  %v563_v63 = vsel %vm505_vm0, %v1729_v58, 0.0 }
 0x3c4   :  { %v1734_v1 = vpop.eup %1334  ;;  %1344 = vpow2.f32 %v804_v53  ;;  %v806_v56 = vmul.f32 1.442695, %v796_v59  ;;  %v797_v3 = vsub.f32 %v1684_v0, %v781_v62  ;;  %564 = vadd.xlane.f32.xlu1 %v563_v63 }
 0x3c5   :  { %v784_v5 = vpop.xlane.xlu0 %783  ;;  %v566_v7 = vsel %vm505_vm0, %v1734_v1, 0.0 }
 0x3c6   :  { %v1739_v9 = vpop.eup %1336  ;;  %1346 = vpow2.f32 %v806_v56  ;;  %v808_v61 = vmul.f32 1.442695, %v797_v3  ;;  %v798_v10 = vsub.f32 %v1688_v2, %v784_v5  ;;  %567 = vadd.xlane.f32.xlu0 %v566_v7 }
 0x3c7   :  { %v787_v11 = vpop.xlane.xlu1 %786  ;;  %v569_v12 = vsel %vm505_vm0, %v1739_v9, 0.0 }
 0x3c8   :  { %v1744_v14 = vpop.eup %1338  ;;  %1348 = vpow2.f32 %v808_v61  ;;  %v810_v0 = vmul.f32 1.442695, %v798_v10  ;;  %v799_v15 = vsub.f32 %v1692_v4, %v787_v11  ;;  %570 = vadd.xlane.f32.xlu1 %v569_v12 }
 0x3c9   :  { %v790_v13 = vpop.xlane.xlu0 %789  ;;  %v572_v16 = vsel %vm505_vm0, %v1744_v14, 0.0 }
 0x3ca   :  { %v1749_v17 = vpop.eup %1340  ;;  %1350 = vpow2.f32 %v810_v0  ;;  %v812_v2 = vmul.f32 1.442695, %v799_v15  ;;  %v800_v18 = vsub.f32 %v1696_v6, %v790_v13  ;;  %573 = vadd.xlane.f32.xlu0 %v572_v16 }
 0x3cb   :  { %v793_v19 = vpop.xlane.xlu1 %792  ;;  %v575_v20 = vsel %vm505_vm0, %v1749_v17, 0.0 }
 0x3cc   :  { %v1754_v21 = vpop.eup %1342  ;;  %1352 = vpow2.f32 %v812_v2  ;;  %v814_v4 = vmul.f32 1.442695, %v800_v18  ;;  %v801_v22 = vsub.f32 %v1700_v8, %v793_v19  ;;  %576 = vadd.xlane.f32.xlu1 %v575_v20 }
 0x3cd   :  { %v818_v27 = vsel %vm505_vm0, %v1754_v21, 0.0 }
 0x3ce   :  { %v1759_v29 = vpop.eup %1344  ;;  %1354 = vpow2.f32 %v814_v4  ;;  %v816_v32 = vmul.f32 1.442695, %v801_v22  ;;  %819 = vadd.xlane.f32.xlu0 %v818_v27 }
 0x3cf   :  { %v821_v6 = vsel %vm505_vm0, %v1759_v29, 0.0 }
 0x3d0   :  { %v1763_v33 = vpop.eup %1346  ;;  %1356 = vpow2.f32 %v816_v32  ;;  %822 = vadd.xlane.f32.xlu1 %v821_v6 }
 0x3d1   :  { %v824_v25 = vsel %vm505_vm0, %v1763_v33, 0.0 }
 0x3d2   :  { %v1767_v8 = vpop.eup %1348  ;;  %825 = vadd.xlane.f32.xlu0 %v824_v25 }
 0x3d3   :  { %v827_v37 = vsel %vm505_vm0, %v1767_v8, 0.0 }
 0x3d4   :  { %v1771_v38 = vpop.eup %1350  ;;  %828 = vadd.xlane.f32.xlu1 %v827_v37 }
 0x3d5   :  { %v830_v40 = vsel %vm505_vm0, %v1771_v38, 0.0 }
 0x3d6   :  { %v1775_v36 = vpop.eup %1352  ;;  %831 = vadd.xlane.f32.xlu0 %v830_v40 }
 0x3d7   :  { %v833_v42 = vsel %vm505_vm0, %v1775_v36, 0.0 }
 0x3d8   :  { %v1779_v39 = vpop.eup %1354  ;;  %834 = vadd.xlane.f32.xlu1 %v833_v42 }
 0x3d9   :  { %v836_v45 = vsel %vm505_vm0, %v1779_v39, 0.0 }
 0x3da   :  { %v1783_v46 = vpop.eup %1356  ;;  %837 = vadd.xlane.f32.xlu0 %v836_v45 }
 0x3db   :  { %v839_v41 = vsel %vm505_vm0, %v1783_v46, 0.0 }
 0x3dc   :  { %840 = vadd.xlane.f32.xlu1 %v839_v41 }
 0x44b   :  { %v556_v44 = vpop.xlane.xlu0 %555 }
 0x44c   :  { %1358 = vrcp.f32 %v556_v44 }
 0x44d   :  { %v559_v49 = vpop.xlane.xlu1 %558 }
 0x44e   :  { %1360 = vrcp.f32 %v559_v49 }
 0x44f   :  { %v562_v50 = vpop.xlane.xlu0 %561 }
 0x450   :  { %1362 = vrcp.f32 %v562_v50 }
 0x451   :  { %v565_v48 = vpop.xlane.xlu1 %564 }
 0x452   :  { %1364 = vrcp.f32 %v565_v48 }
 0x453   :  { %v568_v54 = vpop.xlane.xlu0 %567 }
 0x454   :  { %1366 = vrcp.f32 %v568_v54  ;;  %v1310_v54 = vld [vmem:[%s1871_s7] sm:$0xff]  }
 0x455   :  { %v571_v51 = vpop.xlane.xlu1 %570  ;;  %1248 = vmatprep.subr.bf16.mxu1 %v1310_v54 }
 0x456   :  { %v1359_v55 = vpop.eup %1358  ;;  %1368 = vrcp.f32 %v571_v51  ;;  %1249 = vmatpush3.bf16.msra.mxu1 %v1310_v54  ;;  %v1315_v51 = vld [vmem:[%s1871_s7 + $0x28] sm:$0xff]  }
 0x457   :  { %v574_v57 = vpop.xlane.xlu0 %573  ;;  %v586_v62 = vmul.f32 %v1359_v55, %v1714_v43  ;;  %v1316_v55 = vld [vmem:[%s1871_s7 + $0x30] sm:$0xff]  }
 0x458   :  { %v1361_v53 = vpop.eup %1360  ;;  %1370 = vrcp.f32 %v574_v57  ;;  %v1317_v57 = vld [vmem:[%s1871_s7 + $0x38] sm:$0xff]  }
 0x459   :  { %v577_v59 = vpop.xlane.xlu1 %576  ;;  %v587_v63 = vmul.f32 %v1361_v53, %v1719_v47 }
 0x45a   :  { %v1363_v56 = vpop.eup %1362  ;;  %1372 = vrcp.f32 %v577_v59 }
 0x45b   :  { %v820_v3 = vpop.xlane.xlu0 %819  ;;  %v594_v5 = vpack.c.bf16 %v587_v63, %v586_v62  ;;  %v588_v61 = vmul.f32 %v1363_v56, %v1724_v52 }
 0x45c   :  { %v1365_v7 = vpop.eup %1364  ;;  %1374 = vrcp.f32 %v820_v3 }
 0x45d   :  { %v589_v10 = vmul.f32 %v1365_v7, %v1729_v58  ;;  %v823_v11 = vpop.xlane.xlu1 %822  ;;  %1220 = vmatprep.mubr.msk.bf16.mxu0 %vm505_vm0, %v594_v5 }
 0x45e   :  { %v1367_v12 = vpop.eup %1366  ;;  %1376 = vrcp.f32 %v823_v11 }
 0x45f   :  { %v826_v0 = vpop.xlane.xlu0 %825  ;;  %v595_v15 = vpack.c.bf16 %v589_v10, %v588_v61  ;;  %v590_v13 = vmul.f32 %v1367_v12, %v1734_v1 }
 0x460   :  { %v1369_v43 = vpop.eup %1368  ;;  %1378 = vrcp.f32 %v826_v0 }
 0x461   :  { %v829_v47 = vpop.xlane.xlu1 %828  ;;  %1221 = vmatmul.mubr.msk.bf16.vlgmr.msra.gmra.mrb[12].mxu0 %vm505_vm0, %v595_v15  ;;  %v591_v16 = vmul.f32 %v1369_v43, %v1739_v9 }
 0x462   :  { %v1371_v2 = vpop.eup %1370  ;;  %1380 = vrcp.f32 %v829_v47  ;;  %1239 = vmatpush3.bf16.msra.mxu0 %v1633_v60 }
 0x463   :  { %v832_v52 = vpop.xlane.xlu0 %831  ;;  %v596_v58 = vpack.c.bf16 %v591_v16, %v590_v13  ;;  %v592_v20 = vmul.f32 %v1371_v2, %v1744_v14 }
 0x464   :  { %v1373_v18 = vpop.eup %1372  ;;  %1382 = vrcp.f32 %v832_v52 }
 0x465   :  { %v835_v19 = vpop.xlane.xlu1 %834  ;;  %1224 = vmatprep.mubr.msk.bf16.mxu0 %vm505_vm0, %v596_v58  ;;  %v593_v4 = vmul.f32 %v1373_v18, %v1749_v17 }
 0x466   :  { %v1375_v22 = vpop.eup %1374  ;;  %1384 = vrcp.f32 %v835_v19 }
 0x467   :  { %v838_v1 = vpop.xlane.xlu0 %837  ;;  %v597_v27 = vpack.c.bf16 %v593_v4, %v592_v20  ;;  %v850_v60 = vmul.f32 %v1375_v22, %v1754_v21 }
 0x468   :  { %v1377_v9 = vpop.eup %1376  ;;  %1386 = vrcp.f32 %v838_v1 }
 0x469   :  { %v841_v32 = vpop.xlane.xlu1 %840  ;;  %1225 = vmatmul.mubr.msk.bf16.gmra.mrb[16].mxu0 %vm505_vm0, %v597_v27  ;;  %v851_v6 = vmul.f32 %v1377_v9, %v1759_v29 }
 0x46a   :  { %v1379_v25 = vpop.eup %1378  ;;  %1388 = vrcp.f32 %v841_v32 }
 0x46b   :  { %v858_v37 = vpack.c.bf16 %v851_v6, %v850_v60  ;;  %v852_v14 = vmul.f32 %v1379_v25, %v1763_v33 }
 0x46c   :  { %v1381_v40 = vpop.eup %1380 }
 0x46d   :  { %v853_v17 = vmul.f32 %v1381_v40, %v1767_v8  ;;  %1240 = vmatprep.mubr.msk.bf16.mxu0 %vm505_vm0, %v858_v37 }
 0x46e   :  { %v1383_v42 = vpop.eup %1382 }
 0x46f   :  { %v859_v45 = vpack.c.bf16 %v853_v17, %v852_v14  ;;  %v854_v44 = vmul.f32 %v1383_v42, %v1771_v38  ;;  %v1311_v38 = vld [vmem:[%s1871_s7 + $0x8] sm:$0xff]  }
 0x470   :  { %v1385_v41 = vpop.eup %1384  ;;  %1250 = vmatprep.subr.bf16.mxu1 %v1311_v38 }
 0x471   :  { %1241 = vmatmul.mubr.msk.bf16.vlgmr.msra.gmra.mrb[20].mxu0 %vm505_vm0, %v859_v45  ;;  %v855_v21 = vmul.f32 %v1385_v41, %v1775_v36  ;;  %1251 = vmatpush3.bf16.msra.mxu1 %v1311_v38  ;;  %v1312_v36 = vld [vmem:[%s1871_s7 + $0x10] sm:$0xff]  }
 0x472   :  { %v1387_v29 = vpop.eup %1386  ;;  %1252 = vmatprep.subr.bf16.mxu1 %v1312_v36 }
 0x473   :  { %v860_v49 = vpack.c.bf16 %v855_v21, %v854_v44  ;;  %v856_v33 = vmul.f32 %v1387_v29, %v1779_v39  ;;  %v1313_v39 = vld [vmem:[%s1871_s7 + $0x18] sm:$0xff]  }
 0x474   :  { %v1389_v50 = vpop.eup %1388 }
 0x475   :  { %1244 = vmatprep.mubr.msk.bf16.mxu0 %vm505_vm0, %v860_v49  ;;  %v857_v8 = vmul.f32 %v1389_v50, %v1783_v46  ;;  %1253 = vmatpush3.bf16.msra.mxu1 %v1312_v36  ;;  %v1314_v46 = vld [vmem:[%s1871_s7 + $0x20] sm:$0xff]   ;;  %s1467_s7 = smov [#allocation8]  }
 0x476   :  { %1254 = vmatprep.subr.bf16.mxu1 %v1313_v39  ;;  %s1091_s29 = sshll.u32 %s1467_s7, 4  ;;  %s1092_s29 = int_to_ptr.vmem [resolvable:$true] %s1091_s29 }
 0x477   :  { %v861_v48 = vpack.c.bf16 %v857_v8, %v856_v33  ;;  %s1434_s6 = scalar_lea.vmem %s1092_s29, 512  ;;  %p1439_p3 = scmp.lt.s32.totalorder %s1092_s29, %s1092_s29 }
 0x478   :  { %p1435_p2 = scmp.ne.s32.totalorder %s1092_s29, %s1434_s6  ;;  %p1440_p4 = scmp.lt.s32.totalorder %s1434_s6, %s1434_s6 }
 0x479   :  { %1245 = vmatmul.mubr.msk.bf16.gmra.mrb[24].mxu0 %vm505_vm0, %v861_v48  ;;  %1255 = vmatpush3.bf16.msra.mxu1 %v1313_v39 }
 0x47a   :  { %1256 = vmatprep.subr.bf16.mxu1 %v1314_v46  ;;  %p1441_p5 = por %p1440_p4, %p1439_p3 }
 0x47c   :  { %p1442_p6 = pnand %p1441_p5, %p1435_p2 }
 0x47d   :  { %1257 = vmatpush3.bf16.msra.mxu1 %v1314_v46 }
 0x47e   :  { %1258 = vmatprep.subr.bf16.mxu1 %v1315_v51 }
 0x481   :  { %1259 = vmatpush3.bf16.msra.mxu1 %v1315_v51 }
 0x482   :  { %1260 = vmatprep.subr.bf16.mxu1 %v1316_v55 }
 0x485   :  { %1261 = vmatpush3.bf16.msra.mxu1 %v1316_v55 }
 0x486   :  { %1262 = vmatprep.subr.bf16.mxu1 %v1317_v57 }
 0x489   :  { %1263 = vmatpush3.bf16.msra.mxu1 %v1317_v57 }
 0x534   :  { %v1222_v53 = vpop.f32.mrb[12].mxu0 }
 0x535   :  { %v678_v59 = vmul.f32 %v1222_v53, %v1588_v23  ;;  %v645_v62 = vpop.f32.mrb[13].mxu0 }
 0x536   :  { %v676_v63 = vmul.f32 %v645_v62, %v1608_v30  ;;  %v1223_v56 = vpop.f32.mrb[14].mxu0 }
 0x537   :  { %v679_v3 = vmul.f32 %v1223_v56, %v1598_v26  ;;  %v648_v5 = vpop.f32.mrb[15].mxu0 }
 0x538   :  { %v684_v7 = vadd.f32 %v678_v59, %v676_v63  ;;  %v677_v61 = vmul.f32 %v648_v5, %v1613_v31 }
 0x53a   :  { %v685_v10 = vadd.f32 %v679_v3, %v677_v61 }
 0x53c   :  { %v1226_v11 = vpop.f32.mrb[16].mxu0 }
 0x53d   :  { %v661_v12 = vpop.f32.mrb[17].mxu0  ;;  %v682_v47 = vmul.f32 %v1226_v11, %v1593_v24 }
 0x53e   :  { %v680_v0 = vmul.f32 %v661_v12, %v1618_v34  ;;  %v1227_v15 = vpop.f32.mrb[18].mxu0 }
 0x53f   :  { %v664_v43 = vpop.f32.mrb[19].mxu0  ;;  %v683_v52 = vmul.f32 %v1227_v15, %v1603_v28 }
 0x540   :  { %v686_v13 = vadd.f32 %v684_v7, %v680_v0  ;;  %v681_v16 = vmul.f32 %v664_v43, %v1623_v35 }
 0x542   :  { %v688_v2 = vadd.f32 %v686_v13, %v682_v47  ;;  %v687_v58 = vadd.f32 %v685_v10, %v681_v16 }
 0x544   :  { %v689_v18 = vadd.f32 %v687_v58, %v683_v52  ;;  %v1242_v19 = vpop.f32.mrb[20].mxu0 }
 0x545   :  { %v942_v20 = vmul.f32 %v1242_v19, %v1588_v23  ;;  %v909_v4 = vpop.f32.mrb[21].mxu0 }
 0x546   :  { %v940_v22 = vmul.f32 %v909_v4, %v1608_v30  ;;  %v1243_v1 = vpop.f32.mrb[22].mxu0  ;;  %v960_v27 = vpack.c.bf16 %v689_v18, %v688_v2 }
 0x547   :  { %v943_v9 = vmul.f32 %v1243_v1, %v1598_v26  ;;  %v912_v32 = vpop.f32.mrb[23].mxu0 }
 0x548   :  { %v948_v60 = vadd.f32 %v942_v20, %v940_v22  ;;  %v941_v6 = vmul.f32 %v912_v32, %v1613_v31  ;;  %1264 = vmatprep.mubr.bf16.mxu1 %v960_v27  ;;  %v1139_v31 = vld [vmem:[#allocation6] ss:$0 sm:$0xff] }
 0x54a   :  { %v949_v25 = vadd.f32 %v943_v9, %v941_v6 }
 0x54c   :  { %v1246_v37 = vpop.f32.mrb[24].mxu0 }
 0x54d   :  { %v925_v40 = vpop.f32.mrb[25].mxu0  ;;  %v946_v23 = vmul.f32 %v1246_v37, %v1593_v24 }
 0x54e   :  { %v944_v14 = vmul.f32 %v925_v40, %v1618_v34  ;;  %v1247_v17 = vpop.f32.mrb[26].mxu0 }
 0x54f   :  { %v928_v42 = vpop.f32.mrb[27].mxu0  ;;  %v947_v26 = vmul.f32 %v1247_v17, %v1603_v28 }
 0x550   :  { %v950_v45 = vadd.f32 %v948_v60, %v944_v14  ;;  %v945_v30 = vmul.f32 %v928_v42, %v1623_v35 }
 0x552   :  { %v952_v41 = vadd.f32 %v950_v45, %v946_v23  ;;  %v951_v44 = vadd.f32 %v949_v25, %v945_v30 }
 0x554   :  { %v953_v21 = vadd.f32 %v951_v44, %v947_v26 }
 0x556   :  { %v961_v29 = vpack.c.bf16 %v953_v21, %v952_v41 }
 0x558   :  { %1265 = vmatmul.mubr.bf16.vlgmr.msra.gmra.mrb[16].mxu1 %v961_v29 }
 0x62b   :  { %v1266_v49 = vpop.f32.mrb[16].mxu1 }
 0x62c   :  { %v1076_v50 = vadd.f32 %v1266_v49, %v1139_v31  ;;  %v1067_v33 = vpop.f32.mrb[17].mxu1 }
 0x62d   :  { %v1068_v34 = vadd.f32 %v1139_v31, %v1067_v33  ;;  %v1267_v8 = vpop.f32.mrb[18].mxu1 }
 0x62e   :  { %1084 = vst [vmem:[#allocation8 + $0x10] sm:$0xff] %v1076_v50  ;;  %v1079_v24 = vadd.f32 %v1267_v8, %v1139_v31  ;;  %v1070_v48 = vpop.f32.mrb[19].mxu1 }
 0x62f   :  { %1082 = vst [vmem:[#allocation8] sm:$0xff] %v1068_v34  ;;  %v1071_v35 = vadd.f32 %v1139_v31, %v1070_v48 }
 0x630   :  { %1085 = vst [vmem:[#allocation8 + $0x18] sm:$0xff] %v1079_v24 }
 0x631   :  { %1083 = vst [vmem:[#allocation8 + $0x8] sm:$0xff] %v1071_v35 }
 0x632   :  { %1445 = shalt.err (!%p1442_p6)
}
 0x633   :  { %s1446_s12 = scalar_lea.hbm %s1873_s9, 512 }
 0x634   :  { %p1447_p7 = scmp.ne.s32.totalorder %s1873_s9, %s1446_s12  ;;  %p1450_p8 = scmp.lt.u32.totalorder %s1446_s12, %s1873_s9 }
 0x636   :  { %p1452_p9 = pnand %p1450_p8, %p1447_p7 }
 0x638   :  { %1455 = shalt.err (!%p1452_p9)
}
 0x639   :  { %s1468_s15 = smov 128   ;;  %s1469_s16 = smov 8  }
 0x63a   :  { %1097 = dma.vmem_to_hbm [thread:$0]  %s1092_s29, 512, %s1873_s9, [#allocation5], %s1468_s15, %s1468_s15, %s1469_s16  }
 0x63b   :  { %1460 = dma.done.wait [#allocation5], 512  }
 0x63c   :  { %1461 = vsyncadd [#allocation5], 4294966784 }
 0x63d   :  { %1101 = vsyncpa [#allocation4], 1 }
 0x63e   :  { %1102 = vsyncpa [#allocation7], 1 }
 0x63f   :  { %1103 = vsyncpa [#allocation5], 1 }

</bundles_post_ra>
